<compile_context>
chip_gen: v5e
topology: v5e:2x2
jax: 0.10.0
libtpu: 0.0.40
codegen_flags: <defaults>
</compile_context>

<pallas_src>
import functools

import jax
import jax.numpy as jnp
from jax.experimental import pallas as pl
from jax.experimental.pallas import tpu as pltpu

D = 28 * 28  # 784


def _round_up(x, m):
    return ((x + m - 1) // m) * m


def _sublane_multiple(dtype):
    # Required divisor for the second-to-last block dim (8 for 4-byte, 16 for 2-byte dtypes).
    return max(8, 32 // jnp.dtype(dtype).itemsize)


def _autoencoder_kernel(x_ref, we_ref, wd_ref, bd_ref, o_ref):
    # x_ref : (TB, 784)  activations in their native HBM dtype (f32 or bf16)
    # we_ref: (L, 784)   f32 encoder weight, torch-native layout (lane-dense)
    # wd_ref: (L, 784)   f32 decoder weight, pre-transposed once (lane-dense)
    # bd_ref: (1, 784)   f32 effective decoder bias (encoder bias folded in)
    # o_ref : (TB, 784)  sigmoid(decoder(encoder(x)))
    x = x_ref[...].astype(jnp.float32)          # no-op when input is already f32
    L = we_ref.shape[0]

    y = bd_ref[...]                             # (1, 784); broadcasts up on first add
    for j in range(L):                          # tiny static latent dim -> fully unrolled
        # Encoder: z_j = <x, we[j]>            (VPU mul + XLU lane reduce; MXU stays idle)
        z_j = jnp.sum(x * we_ref[j : j + 1, :], axis=-1, keepdims=True)      # (TB, 1)
        # Decoder: y += z_j * wd[j]            (VPU rank-1 broadcast-multiply-add)
        y = y + z_j * wd_ref[j : j + 1, :]

    # sigmoid(y) = 1 / (1 + exp(-y)): exp on the EUP, approx reciprocal also off the VALU slot.
    o_ref[...] = pl.reciprocal(1.0 + jnp.exp(-y), approx=True).astype(o_ref.dtype)


def prepare_params(w_enc, b_enc, w_dec, b_dec):
    """One-time parameter prep (hoisted out of the per-call path).

    w_enc: (L, 784) torch nn.Linear weight -> kept as-is (lane-dense)
    w_dec: (784, L) torch nn.Linear weight -> transposed once to (L, 784) (lane-dense)
    b_enc is folded into the decoder bias: bd_eff = b_dec + b_enc @ w_dec^T.
    """
    we = jnp.asarray(w_enc, jnp.float32)                      # (L, 784)
    wd = jnp.transpose(jnp.asarray(w_dec, jnp.float32))       # (L, 784)
    bd = (jnp.asarray(b_dec, jnp.float32)
          + jnp.asarray(b_enc, jnp.float32) @ wd).reshape(1, D)  # (1, 784)
    return we, wd, bd


@functools.partial(jax.jit, static_argnames=("block_b", "out_dtype"))
def autoencoder_forward(x_nchw, we, wd, bd, *, block_b=1024, out_dtype=None):
    """Forward pass matching the PyTorch Autoencoder: (B,1,28,28) -> (B,1,28,28).

    block_b : max batch tile (1024 rows f32 ~= 3.2 MB/tile; pipeline buffers + f32
              temporaries stay well under the 48 MiB VMEM budget on v5e/v6e/v7x).
    out_dtype: HBM dtype of the result (None = same as input; bf16 halves writeback).
    """
    B = x_nchw.shape[0]
    L = we.shape[0]

    in_dtype = jnp.dtype(x_nchw.dtype)
    out_dt = in_dtype if out_dtype is None else jnp.dtype(out_dtype)
    x_flat = x_nchw.reshape(B, D)                 # contiguous view == torch x.view(-1, 784)

    # --- Tile selection -------------------------------------------------------------------
    # Sublane-divisibility applies to both the input and output block dtypes.
    sub = max(_sublane_multiple(in_dtype), _sublane_multiple(out_dt))
    if B <= 2 * sub:
        tb = B                                    # single full-array block (exempt from rule)
    else:
        block_b_eff = _round_up(max(block_b, 1), sub)
        # At least two blocks so ("parallel",) can shard across v7x's two TensorCores.
        tb = min(block_b_eff, _round_up(pl.cdiv(B, 2), sub))
    n_blocks = pl.cdiv(B, tb)                     # ragged last block handled by Pallas masking

    param_bytes = (2 * L * D + D) * 4
    io_bytes = B * D * (in_dtype.itemsize + out_dt.itemsize)

    out_flat = pl.pallas_call(
        _autoencoder_kernel,
        out_shape=jax.ShapeDtypeStruct((B, D), out_dt),
        grid=(n_blocks,),
        in_specs=[
            pl.BlockSpec((tb, D), lambda i: (i, 0)),          # activations: batch-tiled
            pl.BlockSpec((L, D), lambda i: (0, 0)),           # encoder weight: grid-invariant
            pl.BlockSpec((L, D), lambda i: (0, 0)),           # decoder weight (pre-transposed)
            pl.BlockSpec((1, D), lambda i: (0, 0)),           # effective decoder bias
        ],
        out_specs=pl.BlockSpec((tb, D), lambda i: (i, 0)),
        compiler_params=pltpu.CompilerParams(
            dimension_semantics=("parallel",),                # shard batch tiles across TCs
            vmem_limit_bytes=48 * 1024 * 1024,                # > v5e/v6e defaults, < v7x 64 MiB
        ),
        cost_estimate=pl.CostEstimate(
            flops=4 * B * D * L + 2 * B * D,
            transcendentals=2 * B * D,                        # exp + reciprocal per element
            bytes_accessed=io_bytes + param_bytes,
        ),
    )(x_flat, we, wd, bd)

    return out_flat.reshape(B, 1, 28, 28)                     # == torch z.view(-1, 1, 28, 28)


def init_params(key, dim_latent=2):
    """Deterministic init mimicking torch.nn.Linear default (U[-1/sqrt(fan_in), +])."""
    k_we, k_be, k_wd, k_bd = jax.random.split(key, 4)
    bound_e = 1.0 / jnp.sqrt(D)
    bound_d = 1.0 / jnp.sqrt(dim_latent)
    w_enc = jax.random.uniform(k_we, (dim_latent, D), jnp.float32, -bound_e, bound_e)
    b_enc = jax.random.uniform(k_be, (dim_latent,), jnp.float32, -bound_e, bound_e)
    w_dec = jax.random.uniform(k_wd, (D, dim_latent), jnp.float32, -bound_d, bound_d)
    b_dec = jax.random.uniform(k_bd, (D,), jnp.float32, -bound_d, bound_d)
    return w_enc, b_enc, w_dec, b_dec


def _reference(x, w_enc, b_enc, w_dec, b_dec):
    B = x.shape[0]
    x_flat = x.reshape(B, D)
    z = x_flat @ w_enc.T + b_enc
    return jax.nn.sigmoid(z @ w_dec.T + b_dec).reshape(B, 1, 28, 28)


if __name__ == "__main__":
    key = jax.random.PRNGKey(0)
    k_x, k_p = jax.random.split(key)

    L = 2
    w_enc, b_enc, w_dec, b_dec = init_params(k_p, dim_latent=L)
    we, wd, bd = prepare_params(w_enc, b_enc, w_dec, b_dec)      # one-time prep

    # 1) Tiny batch, f32 I/O, single full-array block.
    B = 2
    x = jax.random.uniform(k_x, (B, 1, 28, 28), jnp.float32)     # MNIST-like input
    out = jax.block_until_ready(autoencoder_forward(x, we, wd, bd))
    ref = _reference(x, w_enc, b_enc, w_dec, b_dec)
    assert out.shape == (B, 1, 28, 28)
    assert jnp.allclose(out, ref, atol=2e-3, rtol=2e-3)

    # 2) Mid batch with a small tile: multiple blocks + ragged last block (no padding pass),
    #    bf16 output (input stays f32 -> no extra convert pass, full-precision encoder dot).
    B2 = 40
    x2 = jax.random.uniform(jax.random.PRNGKey(1), (B2, 1, 28, 28), jnp.float32)
    out2 = jax.block_until_ready(
        autoencoder_forward(x2, we, wd, bd, block_b=16, out_dtype=jnp.bfloat16))
    ref2 = _reference(x2, w_enc, b_enc, w_dec, b_dec)
    assert out2.shape == (B2, 1, 28, 28)
    assert jnp.allclose(out2.astype(jnp.float32), ref2, atol=1e-2, rtol=1e-2)

    # 3) Larger batch with default tiling: guarantees >= 2 grid blocks (v7x megacore) and a
    #    non-divisible last block, all without wrapper-side pad/slice copies.
    B3 = 300
    x3 = jax.random.uniform(jax.random.PRNGKey(2), (B3, 1, 28, 28), jnp.float32)
    out3 = jax.block_until_ready(autoencoder_forward(x3, we, wd, bd))
    ref3 = _reference(x3, w_enc, b_enc, w_dec, b_dec)
    assert out3.shape == (B3, 1, 28, 28)
    assert jnp.allclose(out3, ref3, atol=2e-3, rtol=2e-3)

    print("KERNEL_OK")
</pallas_src>

<mosaic_0001>
module attributes {stable_mosaic.version = 11 : i64} {
  func.func @_autoencoder_kernel(%arg0: i32, %arg1: memref<2x784xf32, #tpu.memory_space<vmem>>, %arg2: memref<2x784xf32, #tpu.memory_space<vmem>>, %arg3: memref<2x784xf32, #tpu.memory_space<vmem>>, %arg4: memref<1x784xf32, #tpu.memory_space<vmem>>, %arg5: memref<2x784xf32, #tpu.memory_space<vmem>>) attributes {dimension_semantics = [#tpu.dimension_semantics<parallel>], iteration_bounds = array<i64: 1>, scalar_prefetch = 0 : i64, scratch_operands = 0 : i64, tpu.core_type = #tpu.core_type<tc>, window_params = [{transform_indices = @transform_0, window_bounds = array<i64: 2, 784>}, {pipeline_mode = #tpu.pipeline_mode<synchronous>, transform_indices = @transform_1, window_bounds = array<i64: 2, 784>}, {pipeline_mode = #tpu.pipeline_mode<synchronous>, transform_indices = @transform_2, window_bounds = array<i64: 2, 784>}, {pipeline_mode = #tpu.pipeline_mode<synchronous>, transform_indices = @transform_3, window_bounds = array<i64: 1, 784>}, {transform_indices = @transform_4, window_bounds = array<i64: 2, 784>}]} {
    %c0 = arith.constant 0 : index
    %c0_0 = arith.constant 0 : index
    %0 = vector.load %arg1[%c0, %c0_0] : memref<2x784xf32, #tpu.memory_space<vmem>>, vector<2x784xf32>
    %c0_1 = arith.constant 0 : index
    %c0_2 = arith.constant 0 : index
    %1 = vector.load %arg4[%c0_1, %c0_2] : memref<1x784xf32, #tpu.memory_space<vmem>>, vector<1x784xf32>
    %c0_3 = arith.constant 0 : index
    %c0_4 = arith.constant 0 : index
    %2 = vector.load %arg2[%c0_3, %c0_4] : memref<2x784xf32, #tpu.memory_space<vmem>>, vector<1x784xf32>
    %3 = vector.broadcast %2 : vector<1x784xf32> to vector<2x784xf32>
    %4 = arith.mulf %0, %3 : vector<2x784xf32>
    %cst = arith.constant dense<0.000000e+00> : vector<2xf32>
    %5 = vector.multi_reduction <add>, %4, %cst [1] : vector<2x784xf32> to vector<2xf32>
    %6 = vector.shape_cast %5 : vector<2xf32> to vector<2x1xf32>
    %c0_5 = arith.constant 0 : index
    %c0_6 = arith.constant 0 : index
    %7 = vector.load %arg3[%c0_5, %c0_6] : memref<2x784xf32, #tpu.memory_space<vmem>>, vector<1x784xf32>
    %8 = vector.broadcast %6 : vector<2x1xf32> to vector<2x784xf32>
    %9 = vector.broadcast %7 : vector<1x784xf32> to vector<2x784xf32>
    %10 = arith.mulf %8, %9 : vector<2x784xf32>
    %11 = vector.broadcast %1 : vector<1x784xf32> to vector<2x784xf32>
    %12 = arith.addf %11, %10 : vector<2x784xf32>
    %c1 = arith.constant 1 : index
    %c0_7 = arith.constant 0 : index
    %13 = vector.load %arg2[%c1, %c0_7] : memref<2x784xf32, #tpu.memory_space<vmem>>, vector<1x784xf32>
    %14 = vector.broadcast %13 : vector<1x784xf32> to vector<2x784xf32>
    %15 = arith.mulf %0, %14 : vector<2x784xf32>
    %cst_8 = arith.constant dense<0.000000e+00> : vector<2xf32>
    %16 = vector.multi_reduction <add>, %15, %cst_8 [1] : vector<2x784xf32> to vector<2xf32>
    %17 = vector.shape_cast %16 : vector<2xf32> to vector<2x1xf32>
    %c1_9 = arith.constant 1 : index
    %c0_10 = arith.constant 0 : index
    %18 = vector.load %arg3[%c1_9, %c0_10] : memref<2x784xf32, #tpu.memory_space<vmem>>, vector<1x784xf32>
    %19 = vector.broadcast %17 : vector<2x1xf32> to vector<2x784xf32>
    %20 = vector.broadcast %18 : vector<1x784xf32> to vector<2x784xf32>
    %21 = arith.mulf %19, %20 : vector<2x784xf32>
    %22 = arith.addf %12, %21 : vector<2x784xf32>
    %cst_11 = arith.constant 0.000000e+00 : f32
    %23 = vector.broadcast %cst_11 : f32 to vector<2x784xf32>
    %24 = arith.subf %23, %22 : vector<2x784xf32>
    %25 = math.exp %24 : vector<2x784xf32>
    %cst_12 = arith.constant 1.000000e+00 : f32
    %26 = vector.broadcast %cst_12 : f32 to vector<2x784xf32>
    %27 = arith.addf %26, %25 : vector<2x784xf32>
    %28 = tpu.reciprocal %27 {approx = true} : vector<2x784xf32> -> vector<2x784xf32>
    %c0_13 = arith.constant 0 : index
    %c0_14 = arith.constant 0 : index
    %29 = vector.load %arg5[%c0_13, %c0_14] : memref<2x784xf32, #tpu.memory_space<vmem>>, vector<2x784xf32>
    tpu.vector_store %arg5[%c0_13, %c0_14], %28 {strides = array<i32>} : memref<2x784xf32, #tpu.memory_space<vmem>>, vector<2x784xf32>,
    return
  }
  func.func @transform_0(%arg0: i32) -> (i32, i32) {
    %c0_i32 = arith.constant 0 : i32
    %c0_i32_0 = arith.constant 0 : i32
    return %arg0, %c0_i32 : i32, i32
  }
  func.func @transform_1(%arg0: i32) -> (i32, i32) {
    %c0_i32 = arith.constant 0 : i32
    %c0_i32_0 = arith.constant 0 : i32
    %c0_i32_1 = arith.constant 0 : i32
    return %c0_i32, %c0_i32_0 : i32, i32
  }
  func.func @transform_2(%arg0: i32) -> (i32, i32) {
    %c0_i32 = arith.constant 0 : i32
    %c0_i32_0 = arith.constant 0 : i32
    %c0_i32_1 = arith.constant 0 : i32
    return %c0_i32, %c0_i32_0 : i32, i32
  }
  func.func @transform_3(%arg0: i32) -> (i32, i32) {
    %c0_i32 = arith.constant 0 : i32
    %c0_i32_0 = arith.constant 0 : i32
    %c0_i32_1 = arith.constant 0 : i32
    return %c0_i32, %c0_i32_0 : i32, i32
  }
  func.func @transform_4(%arg0: i32) -> (i32, i32) {
    %c0_i32 = arith.constant 0 : i32
    %c0_i32_0 = arith.constant 0 : i32
    return %arg0, %c0_i32 : i32, i32
  }
}

</mosaic_0001>

<bundles_post_ra>
// kernel: autoencoder_forward.1
= control target key start
LH: loop header
LB: loop body
LE: loop exit
PB: predicated region body
PF: predicated region fallthrough
CT: control target
= control target key end

     0   :  { %vm34_vm0 = vcmask 1041408   ;;  %vm36_vm1 = vcmask 1045508   ;;  %vm38_vm2 = vcmask 1043456   ;;  %vm76_vm3 = vcmask 123904   ;;  %s391_s1 = inlined_call_operand.vmem [shape: f32[2,784], index: 1, kind: input, shape index: {}]   ;;  %s392_s0 = inlined_call_operand.vmem [shape: f32[2,784], index: 0, kind: input, shape index: {}]   ;;  %s393_s2 = inlined_call_operand.vmem [shape: f32[2,784], index: 2, kind: input, shape index: {}]   ;;  %s394_s3 = inlined_call_operand.vmem [shape: f32[1,784], index: 3, kind: input, shape index: {}]   ;;  %s395_s4 = inlined_call_operand.vmem [shape: f32[2,784], index: 4, kind: output, shape index: {}]  }
   0x1   :  { %v20_v0 = vld [vmem:[%s391_s1] ss:$2 sm:$0x7f]  ;;  %v279_v8 = vld [vmem:[%s391_s1 + $0x1] ss:$2 sm:$0x7f] }
   0x2   :  { %v22_v1 = vperm.slane %v20_v0, 0  ;;  %v23_v2 = vperm.slane %v20_v0, 1  ;;  %v24_v3 = vperm.slane %v20_v0, 2  ;;  %v25_v4 = vperm.slane %v20_v0, 3  ;;  %v17_v13 = vld [vmem:[%s392_s0] sm:$0xff] }
   0x3   :  { %v26_v5 = vperm.slane %v20_v0, 4  ;;  %v27_v6 = vperm.slane %v20_v0, 5  ;;  %v28_v7 = vperm.slane %v20_v0, 6  ;;  %v129_v12 = vperm.slane %v279_v8, 0  ;;  %v18_v18 = vld [vmem:[%s392_s0 + $0x8] sm:$0x3f] }
   0x4   :  { %v29_v9 = vrot.slane %v23_v2, 6  ;;  %v30_v10 = vrot.slane %v24_v3, 4  ;;  %v31_v11 = vrot.slane %v25_v4, 2  ;;  %v130_v16 = vperm.slane %v279_v8, 1 }
   0x5   :  { %v32_v14 = vrot.slane %v27_v6, 6  ;;  %v33_v15 = vrot.slane %v28_v7, 4  ;;  %v131_v17 = vperm.slane %v279_v8, 2  ;;  %v132_v21 = vperm.slane %v279_v8, 3 }
   0x6   :  { %v35_v19 = vsel %vm34_vm0, %v22_v1, %v29_v9  ;;  %v37_v20 = vsel %vm36_vm1, %v30_v10, %v31_v11  ;;  %v133_v22 = vperm.slane %v279_v8, 4  ;;  %v134_v25 = vperm.slane %v279_v8, 5 }
   0x7   :  { %v39_v23 = vsel %vm38_vm2, %v35_v19, %v37_v20  ;;  %v40_v24 = vsel %vm34_vm0, %v26_v5, %v32_v14  ;;  %v135_v26 = vperm.slane %v279_v8, 6  ;;  %v136_v29 = vrot.slane %v130_v16, 6  ;;  %v19_v20 = vld [vmem:[%s394_s3] sm:$0x7f] }
   0x8   :  { %v41_v27 = vsel %vm38_vm2, %v40_v24, %v33_v15  ;;  %v44_v28 = vmul.f32 %v39_v23, %v17_v13  ;;  %v137_v30 = vrot.slane %v131_v17, 4  ;;  %v138_v32 = vrot.slane %v132_v21, 2 }
   0x9   :  { %v45_v31 = vmul.f32 %v41_v27, %v18_v18  ;;  %v139_v33 = vrot.slane %v134_v25, 6  ;;  %v140_v34 = vrot.slane %v135_v26, 4  ;;  %v141_v35 = vsel %vm34_vm0, %v129_v12, %v136_v29 }
   0xa   :  { %48 = vst [vmem:[#allocation1] ss:$4 sm:$0xff] %v44_v28  ;;  %v142_v36 = vsel %vm36_vm1, %v137_v30, %v138_v32  ;;  %v105_v28 = vperm.slane %v19_v20, 0  ;;  %v106_v29 = vperm.slane %v19_v20, 1  ;;  %v107_v30 = vperm.slane %v19_v20, 2 }
   0xb   :  { %50 = vst [vmem:[#allocation1 + $0x20] ss:$4 sm:$0xff] %v45_v31  ;;  %v144_v37 = vsel %vm34_vm0, %v133_v22, %v139_v33  ;;  %v143_v38 = vsel %vm38_vm2, %v141_v35, %v142_v36  ;;  %v108_v31 = vperm.slane %v19_v20, 3  ;;  %v109_v32 = vperm.slane %v19_v20, 4 }
   0xc   :  { %v145_v39 = vsel %vm38_vm2, %v144_v37, %v140_v34  ;;  %v148_v42 = vmul.f32 %v143_v38, %v17_v13  ;;  %v280_v33 = vld [vmem:[%s393_s2 + $0x1] ss:$2 sm:$0x7f]  ;;  %v110_v36 = vperm.slane %v19_v20, 5  ;;  %v111_v37 = vperm.slane %v19_v20, 6 }
   0xd   :  { %v149_v45 = vmul.f32 %v145_v39, %v18_v18  ;;  %v81_v18 = vld [vmem:[%s393_s2] ss:$2 sm:$0x7f]  ;;  %vm270_vm4 = vcmask 1043458   ;;  %vm272_vm6 = vcmask 128004  }
   0xe   :  { %v83_v21 = vperm.slane %v81_v18, 0  ;;  %v84_v22 = vperm.slane %v81_v18, 1  ;;  %v85_v23 = vperm.slane %v81_v18, 2  ;;  %v86_v24 = vperm.slane %v81_v18, 3  ;;  %vm271_vm5 = vmor %vm270_vm4, %vm34_vm0 }
   0xf   :  { %v87_v25 = vperm.slane %v81_v18, 4  ;;  %v88_v26 = vperm.slane %v81_v18, 5  ;;  %v89_v27 = vperm.slane %v81_v18, 6  ;;  %vm273_vm7 = vmor %vm272_vm6, %vm271_vm5 }
  0x11   :  { %v51_v40 = vld.sshfl [vmem:[#allocation1] sm:$0xff pattern:$0x73625140]  ;;  %v52_v41 = vld.sshfl [vmem:[#allocation1 + $0x8] sm:$0xff pattern:$0x73625140] }
  0x12   :  { %v53_v43 = vld.sshfl [vmem:[#allocation1 + $0x10] sm:$0xff pattern:$0x73625140]  ;;  %v54_v44 = vld.sshfl [vmem:[#allocation1 + $0x18] sm:$0xff pattern:$0x73625140] }
  0x13   :  { %v55_v46 = vld.sshfl [vmem:[#allocation1 + $0x20] sm:$0xff pattern:$0x73625140]  ;;  %v56_v47 = vld.sshfl [vmem:[#allocation1 + $0x28] sm:$0xff pattern:$0x73625140] }
  0x14   :  { %v57_v48 = vld.sshfl [vmem:[#allocation1 + $0x30] sm:$0xff pattern:$0x73625140]  ;;  %v65_v49 = vsel %vm34_vm0, %v51_v40, 0.0  ;;  %v66_v50 = vsel %vm34_vm0, %v52_v41, 0.0  ;;  %v68_v51 = vsel %vm34_vm0, %v53_v43, 0.0 }
  0x15   :  { %v67_v52 = vadd.f32 %v66_v50, %v65_v49  ;;  %152 = vst [vmem:[#allocation1] ss:$4 sm:$0xff] %v148_v42  ;;  %v70_v53 = vsel %vm34_vm0, %v54_v44, 0.0  ;;  %v72_v55 = vsel %vm34_vm0, %v55_v46, 0.0  ;;  %v74_v57 = vsel %vm34_vm0, %v56_v47, 0.0 }
  0x16   :  { %154 = vst [vmem:[#allocation1 + $0x20] ss:$4 sm:$0xff] %v149_v45  ;;  %v77_v59 = vsel %vm76_vm3, %v57_v48, 0.0  ;;  %v187_v42 = vperm.slane %v280_v33, 0  ;;  %v188_v43 = vperm.slane %v280_v33, 1  ;;  %v189_v44 = vperm.slane %v280_v33, 2 }
  0x17   :  { %v69_v54 = vadd.f32 %v68_v51, %v67_v52  ;;  %v190_v45 = vperm.slane %v280_v33, 3  ;;  %v191_v47 = vperm.slane %v280_v33, 4  ;;  %v192_v48 = vperm.slane %v280_v33, 5 }
  0x18   :  { %v193_v49 = vperm.slane %v280_v33, 6 }
  0x19   :  { %v71_v56 = vadd.f32 %v70_v53, %v69_v54 }
  0x1b   :  { %v73_v58 = vadd.f32 %v72_v55, %v71_v56 }
  0x1c   :  { %v155_v60 = vld.sshfl [vmem:[#allocation1] sm:$0xff pattern:$0x73625140]  ;;  %v156_v61 = vld.sshfl [vmem:[#allocation1 + $0x8] sm:$0xff pattern:$0x73625140] }
  0x1d   :  { %v75_v62 = vadd.f32 %v74_v57, %v73_v58  ;;  %v157_v63 = vld.sshfl [vmem:[#allocation1 + $0x10] sm:$0xff pattern:$0x73625140]  ;;  %v158_v0 = vld.sshfl [vmem:[#allocation1 + $0x18] sm:$0xff pattern:$0x73625140] }
  0x1e   :  { %v169_v2 = vsel %vm34_vm0, %v155_v60, 0.0  ;;  %v170_v3 = vsel %vm34_vm0, %v156_v61, 0.0  ;;  %v172_v4 = vsel %vm34_vm0, %v157_v63, 0.0  ;;  %v159_v5 = vld.sshfl [vmem:[#allocation1 + $0x20] sm:$0xff pattern:$0x73625140] }
  0x1f   :  { %v78_v1 = vadd.f32 %v77_v59, %v75_v62  ;;  %v171_v6 = vadd.f32 %v170_v3, %v169_v2  ;;  %v174_v7 = vsel %vm34_vm0, %v158_v0, 0.0  ;;  %v160_v8 = vld.sshfl [vmem:[#allocation1 + $0x28] sm:$0xff pattern:$0x73625140]  ;;  %v176_v10 = vsel %vm34_vm0, %v159_v5, 0.0 }
  0x20   :  { %v161_v11 = vld.sshfl [vmem:[#allocation1 + $0x30] sm:$0xff pattern:$0x73625140]  ;;  %v178_v13 = vsel %vm34_vm0, %v160_v8, 0.0 }
  0x21   :  { %79 = vadd.xlane.f32.xlu0 %v78_v1  ;;  %v173_v9 = vadd.f32 %v172_v4, %v171_v6  ;;  %v180_v15 = vsel %vm76_vm3, %v161_v11, 0.0 }
  0x23   :  { %v175_v12 = vadd.f32 %v174_v7, %v173_v9 }
  0x25   :  { %v177_v14 = vadd.f32 %v176_v10, %v175_v12 }
  0x27   :  { %v179_v16 = vadd.f32 %v178_v13, %v177_v14 }
  0x29   :  { %v181_v17 = vadd.f32 %v180_v15, %v179_v16 }
  0x2b   :  { %182 = vadd.xlane.f32.xlu0 %v181_v17 }
  0x94   :  { %v80_v19 = vpop.xlane.xlu0 %79 }
  0x95   :  { %v97_v34 = vmul.f32 %v83_v21, %v80_v19  ;;  %v98_v35 = vmul.f32 %v84_v22, %v80_v19  ;;  %v99_v38 = vmul.f32 %v85_v23, %v80_v19  ;;  %v100_v39 = vmul.f32 %v86_v24, %v80_v19 }
  0x96   :  { %v101_v40 = vmul.f32 %v87_v25, %v80_v19  ;;  %v102_v41 = vmul.f32 %v88_v26, %v80_v19  ;;  %v103_v46 = vmul.f32 %v89_v27, %v80_v19 }
  0x97   :  { %v119_v50 = vadd.f32 %v105_v28, %v97_v34  ;;  %v120_v51 = vadd.f32 %v106_v29, %v98_v35  ;;  %v121_v52 = vadd.f32 %v107_v30, %v99_v38  ;;  %v122_v53 = vadd.f32 %v108_v31, %v100_v39 }
  0x98   :  { %v123_v54 = vadd.f32 %v109_v32, %v101_v40  ;;  %v124_v55 = vadd.f32 %v110_v36, %v102_v41  ;;  %v125_v61 = vadd.f32 %v111_v37, %v103_v46 }
  0x9e   :  { %v183_v56 = vpop.xlane.xlu0 %182 }
  0x9f   :  { %v201_v57 = vmul.f32 %v187_v42, %v183_v56  ;;  %v202_v58 = vmul.f32 %v188_v43, %v183_v56  ;;  %v203_v59 = vmul.f32 %v189_v44, %v183_v56  ;;  %v204_v60 = vmul.f32 %v190_v45, %v183_v56 }
  0xa0   :  { %v205_v62 = vmul.f32 %v191_v47, %v183_v56  ;;  %v206_v63 = vmul.f32 %v192_v48, %v183_v56  ;;  %v207_v0 = vmul.f32 %v193_v49, %v183_v56 }
  0xa1   :  { %v208_v1 = vadd.f32 %v201_v57, %v119_v50  ;;  %v209_v2 = vadd.f32 %v202_v58, %v120_v51  ;;  %v210_v3 = vadd.f32 %v203_v59, %v121_v52  ;;  %v211_v4 = vadd.f32 %v204_v60, %v122_v53 }
  0xa2   :  { %v212_v5 = vadd.f32 %v205_v62, %v123_v54  ;;  %v213_v6 = vadd.f32 %v206_v63, %v124_v55  ;;  %v214_v7 = vadd.f32 %v207_v0, %v125_v61 }
  0xa3   :  { %v215_v8 = vsub.f32 0.0, %v208_v1  ;;  %v216_v9 = vsub.f32 0.0, %v209_v2  ;;  %v217_v10 = vsub.f32 0.0, %v210_v3  ;;  %v218_v11 = vsub.f32 0.0, %v211_v4 }
  0xa4   :  { %v219_v12 = vsub.f32 0.0, %v212_v5  ;;  %v220_v13 = vsub.f32 0.0, %v213_v6  ;;  %v221_v14 = vsub.f32 0.0, %v214_v7 }
  0xa5   :  { %v222_v15 = vmul.f32 1.442695, %v215_v8  ;;  %v224_v16 = vmul.f32 1.442695, %v216_v9  ;;  %v226_v17 = vmul.f32 1.442695, %v217_v10 }
  0xa6   :  { %v228_v18 = vmul.f32 1.442695, %v218_v11  ;;  %v230_v19 = vmul.f32 1.442695, %v219_v12  ;;  %v232_v20 = vmul.f32 1.442695, %v220_v13 }
  0xa7   :  { %281 = vpow2.f32 %v222_v15  ;;  %v234_v21 = vmul.f32 1.442695, %v221_v14 }
  0xa8   :  { %283 = vpow2.f32 %v224_v16 }
  0xa9   :  { %285 = vpow2.f32 %v226_v17 }
  0xaa   :  { %287 = vpow2.f32 %v228_v18 }
  0xab   :  { %289 = vpow2.f32 %v230_v19 }
  0xac   :  { %291 = vpow2.f32 %v232_v20 }
  0xad   :  { %v282_v22 = vpop.eup %281  ;;  %293 = vpow2.f32 %v234_v21 }
  0xae   :  { %v284_v23 = vpop.eup %283  ;;  %v236_v24 = vadd.f32 1.0, %v282_v22 }
  0xaf   :  { %v286_v25 = vpop.eup %285  ;;  %v237_v26 = vadd.f32 1.0, %v284_v23 }
  0xb0   :  { %v288_v27 = vpop.eup %287  ;;  %v238_v28 = vadd.f32 1.0, %v286_v25  ;;  %295 = vrcp.f32 %v236_v24 }
  0xb1   :  { %v290_v29 = vpop.eup %289  ;;  %v239_v30 = vadd.f32 1.0, %v288_v27  ;;  %297 = vrcp.f32 %v237_v26 }
  0xb2   :  { %v292_v31 = vpop.eup %291  ;;  %299 = vrcp.f32 %v238_v28  ;;  %v240_v33 = vadd.f32 1.0, %v290_v29 }
  0xb3   :  { %v294_v32 = vpop.eup %293  ;;  %v241_v34 = vadd.f32 1.0, %v292_v31  ;;  %301 = vrcp.f32 %v239_v30 }
  0xb4   :  { %v242_v35 = vadd.f32 1.0, %v294_v32 }
  0xb5   :  { %303 = vrcp.f32 %v241_v34 }
  0xb6   :  { %v296_v36 = vpop.eup %295  ;;  %305 = vrcp.f32 %v242_v35 }
  0xb7   :  { %v298_v37 = vpop.eup %297  ;;  %307 = vrcp.f32 %v240_v33 }
  0xb8   :  { %v300_v38 = vpop.eup %299  ;;  %v257_v39 = vrot.slane %v298_v37, 6 }
  0xb9   :  { %v302_v40 = vpop.eup %301  ;;  %v258_v41 = vrot.slane %v300_v38, 4 }
  0xba   :  { %v259_v42 = vrot.slane %v302_v40, 2  ;;  %v262_v43 = vsel %vm34_vm0, %v296_v36, %v257_v39 }
  0xbb   :  { %v304_v44 = vpop.eup %303 }
  0xbc   :  { %v306_v45 = vpop.eup %305  ;;  %v260_v46 = vrot.slane %v304_v44, 6  ;;  %v263_v47 = vsel %vm36_vm1, %v258_v41, %v259_v42 }
  0xbd   :  { %v308_v48 = vpop.eup %307  ;;  %v261_v49 = vrot.slane %v306_v45, 4  ;;  %v264_v50 = vsel %vm38_vm2, %v262_v43, %v263_v47 }
  0xbe   :  { %v265_v51 = vsel %vm34_vm0, %v308_v48, %v260_v46  ;;  %269 = vst [vmem:[%s395_s4] sm:$0xff] %v264_v50 }
  0xbf   :  { %v266_v52 = vsel %vm38_vm2, %v265_v51, %v261_v49 }
  0xc0   :  { %274 = vst.msk [vmem:[%s395_s4 + $0x8] sm:$0x3f] %vm273_vm7, %v266_v52 }

</bundles_post_ra>
